<compile_context>
chip_gen: v7x
topology: tpu7x:2x2x1
jax: 0.10.0
libtpu: 0.0.40
codegen_flags: <defaults>
</compile_context>

<pallas_src>
import math

import jax
import jax.numpy as jnp
from jax import lax
from jax.experimental import pallas as pl
from jax.experimental.pallas import tpu as pltpu

_INV_SQRT2 = 1.0 / math.sqrt(2.0)


def _gelu_exact(x):
    # torch.nn.GELU() default is the erf-based (exact) GELU.
    return 0.5 * x * (1.0 + lax.erf(x * _INV_SQRT2))


def _round_up(n, m):
    return ((n + m - 1) // m) * m


def ff_kernel(x_ref, w1_ref, b1_ref, w2_ref, b2_ref, o_ref, acc_ref):
    l = pl.program_id(1)

    @pl.when(l == 0)
    def _init():
        # Fold the second bias into the accumulator init -> saves a separate
        # (TM, D) VPU add in the epilogue.
        acc_ref[...] = jnp.broadcast_to(
            b2_ref[...].astype(jnp.float32), acc_ref.shape)

    # Linear 1 on this hidden chunk: (TM, D) @ (D, TL) + b1[l-chunk]
    h = jnp.dot(x_ref[...], w1_ref[...], preferred_element_type=jnp.float32)
    h = h + b1_ref[...].astype(jnp.float32)
    h = _gelu_exact(h)
    # NOTE: operands kept in the input dtype (f32 here) to match the PyTorch
    # reference bit-for-bit; casting h / weights to bf16 roughly doubles MXU
    # throughput on v6e/v7x if the accuracy budget allows.
    acc_ref[...] += jnp.dot(h.astype(w2_ref.dtype), w2_ref[...],
                            preferred_element_type=jnp.float32)

    @pl.when(l == pl.num_programs(1) - 1)
    def _finalize():
        o_ref[...] = acc_ref[...].astype(o_ref.dtype)


def _choose_tiles(M, D_pad, L, itemsize):
    """Pick (TM, TL) so double-buffered tiles + the f32 accumulator fit a
    conservative VMEM budget (sized against v7x's 64 MiB physical VMEM)."""
    tm = min(256, _round_up(M, 8))
    tl = min(512, _round_up(max(L, 1), 128))

    def est(tm_, tl_):
        dbl = 2 * itemsize * (tm_ * D_pad      # x tile (double buffered)
                              + D_pad * tl_    # W1 tile
                              + tl_            # b1 tile
                              + tl_ * D_pad    # W2 tile
                              + D_pad          # b2
                              + tm_ * D_pad)   # out tile
        return dbl + 4 * tm_ * D_pad           # f32 accumulator scratch

    budget = 36 * 1024 * 1024
    while est(tm, tl) > budget and tl > 128:
        tl -= 128
    while est(tm, tl) > budget and tm > 8:
        tm = _round_up(tm // 2, 8)
    return tm, tl, est(tm, tl)


def _pad2d(a, rows, cols):
    pr, pc = rows - a.shape[0], cols - a.shape[1]
    if pr == 0 and pc == 0:
        return a
    return jnp.pad(a, ((0, pr), (0, pc)))


def feed_forward_2d(x2d, w1, b1, w2, b2):
    M, D = x2d.shape
    L = w1.shape[1]
    assert w1.shape == (D, L) and w2.shape == (L, D)

    itemsize = jnp.dtype(x2d.dtype).itemsize
    D_pad = _round_up(D, 128)                      # lane-dense last dims
    tm, tl, vmem_est = _choose_tiles(M, D_pad, L, itemsize)
    L_pad = _round_up(L, tl)
    M_pad = _round_up(M, tm)

    # Zero padding keeps the math exact (gelu(0) == 0, padded weights are 0).
    xp = _pad2d(x2d, M_pad, D_pad)
    w1p = _pad2d(w1, D_pad, L_pad)
    b1p = _pad2d(b1.reshape(1, -1), 1, L_pad)
    w2p = _pad2d(w2, L_pad, D_pad)
    b2p = _pad2d(b2.reshape(1, -1), 1, D_pad)

    grid = (M_pad // tm, L_pad // tl)

    cost = pl.CostEstimate(
        flops=4 * M_pad * D_pad * L_pad,               # two matmuls
        transcendentals=M_pad * L_pad,                 # erf
        bytes_accessed=itemsize * (2 * M_pad * D_pad   # x + out
                                   + 2 * D_pad * L_pad # W1 + W2
                                   + L_pad + D_pad))   # biases

    vmem_limit = min(48 * 1024 * 1024,
                     max(16 * 1024 * 1024, int(vmem_est * 1.25) + (1 << 20)))

    out = pl.pallas_call(
        ff_kernel,
        out_shape=jax.ShapeDtypeStruct((M_pad, D_pad), x2d.dtype),
        grid_spec=pltpu.PrefetchScalarGridSpec(
            num_scalar_prefetch=0,
            grid=grid,
            in_specs=[
                pl.BlockSpec((tm, D_pad), lambda i, l: (i, 0)),   # x row tile
                pl.BlockSpec((D_pad, tl), lambda i, l: (0, l)),   # W1 L-chunk
                pl.BlockSpec((1, tl), lambda i, l: (0, l)),       # b1 L-chunk
                pl.BlockSpec((tl, D_pad), lambda i, l: (l, 0)),   # W2 L-chunk
                pl.BlockSpec((1, D_pad), lambda i, l: (0, 0)),    # b2 (resident)
            ],
            out_specs=pl.BlockSpec((tm, D_pad), lambda i, l: (i, 0)),
            scratch_shapes=[pltpu.VMEM((tm, D_pad), jnp.float32)],
        ),
        compiler_params=pltpu.CompilerParams(
            dimension_semantics=("parallel", "arbitrary"),
            vmem_limit_bytes=vmem_limit,
        ),
        cost_estimate=cost,
    )(xp, w1p, b1p, w2p, b2p)

    return out[:M, :D]


def feed_forward_module(x, w1, b1, w2, b2):
    """x: (batch, seq, in_dim) -> (batch, seq, in_dim)."""
    B, S, D = x.shape
    out2d = feed_forward_2d(x.reshape(B * S, D), w1, b1, w2, b2)
    return out2d.reshape(B, S, D)


if __name__ == "__main__":
    batch, seq, in_dim, latent_dim = 2, 8, 32, 64

    key = jax.random.PRNGKey(0)
    kx, kw1, kb1, kw2, kb2 = jax.random.split(key, 5)

    x = jax.random.normal(kx, (batch, seq, in_dim), dtype=jnp.float32)

    # Deterministic PyTorch-Linear-style init (uniform in +/- 1/sqrt(fan_in)).
    lim1 = 1.0 / math.sqrt(in_dim)
    w1 = jax.random.uniform(kw1, (in_dim, latent_dim), jnp.float32, -lim1, lim1)
    b1 = jax.random.uniform(kb1, (latent_dim,), jnp.float32, -lim1, lim1)
    lim2 = 1.0 / math.sqrt(latent_dim)
    w2 = jax.random.uniform(kw2, (latent_dim, in_dim), jnp.float32, -lim2, lim2)
    b2 = jax.random.uniform(kb2, (in_dim,), jnp.float32, -lim2, lim2)

    out = jax.jit(feed_forward_module)(x, w1, b1, w2, b2)
    jax.block_until_ready(out)

    # Cross-check against a pure-JAX reference of the same math.
    ref = jax.nn.gelu(x.reshape(-1, in_dim) @ w1 + b1[None, :],
                      approximate=False) @ w2 + b2[None, :]
    ref = ref.reshape(batch, seq, in_dim)
    assert jnp.allclose(out, ref, atol=1e-5, rtol=1e-5)

    # TODO(synk): train-mode Dropout (p > 0) via pltpu.prng_seed/prng_random_bits
    # is not implemented; module semantics here are inference (p = 0.0).
    print("KERNEL_OK")
</pallas_src>

<mosaic_0001>
module attributes {stable_mosaic.version = 11 : i64} {
  func.func @ff_kernel(%arg0: i32, %arg1: i32, %arg2: memref<16x128xf32, #tpu.memory_space<vmem>>, %arg3: memref<128x128xf32, #tpu.memory_space<vmem>>, %arg4: memref<1x128xf32, #tpu.memory_space<vmem>>, %arg5: memref<128x128xf32, #tpu.memory_space<vmem>>, %arg6: memref<1x128xf32, #tpu.memory_space<vmem>>, %arg7: memref<16x128xf32, #tpu.memory_space<vmem>>, %arg8: memref<16x128xf32, #tpu.memory_space<vmem>>) attributes {dimension_semantics = [#tpu.dimension_semantics<parallel>, #tpu.dimension_semantics<arbitrary>], iteration_bounds = array<i64: 1, 1>, scalar_prefetch = 0 : i64, scratch_operands = 1 : i64, tpu.core_type = #tpu.core_type<tc>, window_params = [{transform_indices = @transform_0, window_bounds = array<i64: 16, 128>}, {transform_indices = @transform_1, window_bounds = array<i64: 128, 128>}, {transform_indices = @transform_2, window_bounds = array<i64: 1, 128>}, {transform_indices = @transform_3, window_bounds = array<i64: 128, 128>}, {pipeline_mode = #tpu.pipeline_mode<synchronous>, transform_indices = @transform_4, window_bounds = array<i64: 1, 128>}, {transform_indices = @transform_5, window_bounds = array<i64: 16, 128>}]} {
    %c0_i32 = arith.constant 0 : i32
    %0 = arith.cmpi eq, %arg1, %c0_i32 : i32
    %1 = arith.extui %0 : i1 to i32
    %c0_i32_0 = arith.constant 0 : i32
    %2 = arith.cmpi ne, %1, %c0_i32_0 : i32
    scf.if %2 {
      %c0_18 = arith.constant 0 : index
      %c0_19 = arith.constant 0 : index
      %25 = vector.load %arg6[%c0_18, %c0_19] : memref<1x128xf32, #tpu.memory_space<vmem>>, vector<1x128xf32>
      %26 = vector.shape_cast %25 : vector<1x128xf32> to vector<1x128xf32>
      %27 = vector.broadcast %26 : vector<1x128xf32> to vector<16x128xf32>
      %c0_20 = arith.constant 0 : index
      %c0_21 = arith.constant 0 : index
      %28 = vector.load %arg8[%c0_20, %c0_21] : memref<16x128xf32, #tpu.memory_space<vmem>>, vector<16x128xf32>
      tpu.vector_store %arg8[%c0_20, %c0_21], %27 {strides = array<i32>} : memref<16x128xf32, #tpu.memory_space<vmem>>, vector<16x128xf32>,
    } else {
    }
    %c0 = arith.constant 0 : index
    %c0_1 = arith.constant 0 : index
    %3 = vector.load %arg2[%c0, %c0_1] : memref<16x128xf32, #tpu.memory_space<vmem>>, vector<16x128xf32>
    %c0_2 = arith.constant 0 : index
    %c0_3 = arith.constant 0 : index
    %4 = vector.load %arg3[%c0_2, %c0_3] : memref<128x128xf32, #tpu.memory_space<vmem>>, vector<128x128xf32>
    %cst = arith.constant dense<0.000000e+00> : vector<16x128xf32>
    %5 = tpu.matmul %3, %4, %cst {dimension_numbers = #tpu.dot_dimension_numbers<[1], [0], [0], [1], [0, 0, 1, 1], [], []>} : vector<16x128xf32>, vector<128x128xf32>, vector<16x128xf32> -> vector<16x128xf32>
    %c0_4 = arith.constant 0 : index
    %c0_5 = arith.constant 0 : index
    %6 = vector.load %arg4[%c0_4, %c0_5] : memref<1x128xf32, #tpu.memory_space<vmem>>, vector<1x128xf32>
    %7 = vector.broadcast %6 : vector<1x128xf32> to vector<16x128xf32>
    %8 = arith.addf %5, %7 : vector<16x128xf32>
    %cst_6 = arith.constant 5.000000e-01 : f32
    %9 = vector.broadcast %cst_6 : f32 to vector<16x128xf32>
    %10 = arith.mulf %9, %8 : vector<16x128xf32>
    %cst_7 = arith.constant 0.707106769 : f32
    %11 = vector.broadcast %cst_7 : f32 to vector<16x128xf32>
    %12 = arith.mulf %8, %11 : vector<16x128xf32>
    %13 = math.erf %12 : vector<16x128xf32>
    %cst_8 = arith.constant 1.000000e+00 : f32
    %14 = vector.broadcast %cst_8 : f32 to vector<16x128xf32>
    %15 = arith.addf %14, %13 : vector<16x128xf32>
    %16 = arith.mulf %10, %15 : vector<16x128xf32>
    %c0_9 = arith.constant 0 : index
    %c0_10 = arith.constant 0 : index
    %17 = vector.load %arg8[%c0_9, %c0_10] : memref<16x128xf32, #tpu.memory_space<vmem>>, vector<16x128xf32>
    %c0_11 = arith.constant 0 : index
    %c0_12 = arith.constant 0 : index
    %18 = vector.load %arg5[%c0_11, %c0_12] : memref<128x128xf32, #tpu.memory_space<vmem>>, vector<128x128xf32>
    %cst_13 = arith.constant dense<0.000000e+00> : vector<16x128xf32>
    %19 = tpu.matmul %16, %18, %cst_13 {dimension_numbers = #tpu.dot_dimension_numbers<[1], [0], [0], [1], [0, 0, 1, 1], [], []>} : vector<16x128xf32>, vector<128x128xf32>, vector<16x128xf32> -> vector<16x128xf32>
    %20 = arith.addf %17, %19 : vector<16x128xf32>
    %c0_14 = arith.constant 0 : index
    %c0_15 = arith.constant 0 : index
    %21 = vector.load %arg8[%c0_14, %c0_15] : memref<16x128xf32, #tpu.memory_space<vmem>>, vector<16x128xf32>
    tpu.vector_store %arg8[%c0_14, %c0_15], %20 {strides = array<i32>} : memref<16x128xf32, #tpu.memory_space<vmem>>, vector<16x128xf32>,
    %c0_i32_16 = arith.constant 0 : i32
    %22 = arith.cmpi eq, %arg1, %c0_i32_16 : i32
    %23 = arith.extui %22 : i1 to i32
    %c0_i32_17 = arith.constant 0 : i32
    %24 = arith.cmpi ne, %23, %c0_i32_17 : i32
    scf.if %24 {
      %c0_18 = arith.constant 0 : index
      %c0_19 = arith.constant 0 : index
      %25 = vector.load %arg8[%c0_18, %c0_19] : memref<16x128xf32, #tpu.memory_space<vmem>>, vector<16x128xf32>
      %c0_20 = arith.constant 0 : index
      %c0_21 = arith.constant 0 : index
      %26 = vector.load %arg7[%c0_20, %c0_21] : memref<16x128xf32, #tpu.memory_space<vmem>>, vector<16x128xf32>
      tpu.vector_store %arg7[%c0_20, %c0_21], %25 {strides = array<i32>} : memref<16x128xf32, #tpu.memory_space<vmem>>, vector<16x128xf32>,
    } else {
    }
    return
  }
  func.func @transform_0(%arg0: i32, %arg1: i32) -> (i32, i32) {
    %c0_i32 = arith.constant 0 : i32
    %c0_i32_0 = arith.constant 0 : i32
    return %arg0, %c0_i32 : i32, i32
  }
  func.func @transform_1(%arg0: i32, %arg1: i32) -> (i32, i32) {
    %c0_i32 = arith.constant 0 : i32
    %c0_i32_0 = arith.constant 0 : i32
    return %c0_i32, %arg1 : i32, i32
  }
  func.func @transform_2(%arg0: i32, %arg1: i32) -> (i32, i32) {
    %c0_i32 = arith.constant 0 : i32
    %c0_i32_0 = arith.constant 0 : i32
    return %c0_i32, %arg1 : i32, i32
  }
  func.func @transform_3(%arg0: i32, %arg1: i32) -> (i32, i32) {
    %c0_i32 = arith.constant 0 : i32
    %c0_i32_0 = arith.constant 0 : i32
    return %arg1, %c0_i32 : i32, i32
  }
  func.func @transform_4(%arg0: i32, %arg1: i32) -> (i32, i32) {
    %c0_i32 = arith.constant 0 : i32
    %c0_i32_0 = arith.constant 0 : i32
    %c0_i32_1 = arith.constant 0 : i32
    return %c0_i32, %c0_i32_0 : i32, i32
  }
  func.func @transform_5(%arg0: i32, %arg1: i32) -> (i32, i32) {
    %c0_i32 = arith.constant 0 : i32
    %c0_i32_0 = arith.constant 0 : i32
    return %arg0, %c0_i32 : i32, i32
  }
}

</mosaic_0001>

<bundles_post_ra>
// kernel: feed_forward_module.1
= control target key start
LH: loop header
LB: loop body
LE: loop exit
PB: predicated region body
PF: predicated region fallthrough
CT: control target
= control target key end

     0   :  { %s571_s1 = inlined_call_operand.vmem [shape: f32[128,128], index: 1, kind: input, shape index: {}]   ;;  %s572_s0 = inlined_call_operand.vmem [shape: f32[16,128], index: 0, kind: input, shape index: {}]   ;;  %s573_s3 = inlined_call_operand.vmem [shape: f32[128,128], index: 3, kind: input, shape index: {}]   ;;  %s574_s2 = inlined_call_operand.vmem [shape: f32[1,128], index: 2, kind: input, shape index: {}]   ;;  %s575_s4 = inlined_call_operand.vmem [shape: f32[1,128], index: 4, kind: input, shape index: {}]   ;;  %s576_s5 = inlined_call_operand.vmem [shape: f32[16,128], index: 5, kind: output, shape index: {}]  }
   0x1   :  { %v35_v0 = vld [vmem:[%s571_s1] sm:$0xff]  ;;  %v36_v1 = vld [vmem:[%s571_s1 + $0x8] sm:$0xff]  ;;  %v37_v2 = vld [vmem:[%s571_s1 + $0x10] sm:$0xff] }
   0x2   :  { %v359_v3 = vpack.c.bf16 %v36_v1, %v35_v0  ;;  %v38_v4 = vld [vmem:[%s571_s1 + $0x18] sm:$0xff]  ;;  %v39_v6 = vld [vmem:[%s571_s1 + $0x20] sm:$0xff]  ;;  %v40_v7 = vld [vmem:[%s571_s1 + $0x28] sm:$0xff] }
   0x3   :  { %v363_v5 = vpack.c.bf16 %v38_v4, %v37_v2  ;;  %v367_v8 = vpack.c.bf16 %v40_v7, %v39_v6  ;;  %v41_v9 = vld [vmem:[%s571_s1 + $0x30] sm:$0xff]  ;;  %v42_v10 = vld [vmem:[%s571_s1 + $0x38] sm:$0xff]  ;;  %v33_v11 = vld [vmem:[%s572_s0] sm:$0xff] }
   0x4   :  { %360 = vmatprep.subr.bf16.mxu0 %v359_v3  ;;  %321 = vmatprep.mubr.f32.mxu0 %v33_v11  ;;  %v145_v12 = vld [vmem:[%s573_s3] sm:$0xff]  ;;  %v146_v13 = vld [vmem:[%s573_s3 + $0x8] sm:$0xff]  ;;  %v147_v14 = vld [vmem:[%s573_s3 + $0x10] sm:$0xff]  ;;  %v371_v20 = vpack.c.bf16 %v42_v10, %v41_v9 }
   0x5   :  { %362 = vmatpush3.bf16.msra.mxu0 %v359_v3  ;;  %v391_v15 = vpack.c.bf16 %v146_v13, %v145_v12  ;;  %v148_v16 = vld [vmem:[%s573_s3 + $0x18] sm:$0xff]  ;;  %v149_v18 = vld [vmem:[%s573_s3 + $0x20] sm:$0xff]  ;;  %v150_v19 = vld [vmem:[%s573_s3 + $0x28] sm:$0xff] }
   0x6   :  { %364 = vmatprep.subr.bf16.mxu0 %v363_v5  ;;  %v395_v17 = vpack.c.bf16 %v148_v16, %v147_v14  ;;  %v43_v21 = vld [vmem:[%s571_s1 + $0x40] sm:$0xff]  ;;  %v44_v22 = vld [vmem:[%s571_s1 + $0x48] sm:$0xff]  ;;  %v399_v23 = vpack.c.bf16 %v150_v19, %v149_v18  ;;  %v45_v25 = vld [vmem:[%s571_s1 + $0x50] sm:$0xff] }
   0x7   :  { %392 = vmatprep.subr.bf16.mxu1 %v391_v15  ;;  %v375_v24 = vpack.c.bf16 %v44_v22, %v43_v21  ;;  %v46_v26 = vld [vmem:[%s571_s1 + $0x58] sm:$0xff]  ;;  %v47_v28 = vld [vmem:[%s571_s1 + $0x60] sm:$0xff]  ;;  %v48_v29 = vld [vmem:[%s571_s1 + $0x68] sm:$0xff] }
   0x8   :  { %394 = vmatpush3.bf16.msra.mxu1 %v391_v15  ;;  %v379_v27 = vpack.c.bf16 %v46_v26, %v45_v25  ;;  %v383_v30 = vpack.c.bf16 %v48_v29, %v47_v28  ;;  %v49_v31 = vld [vmem:[%s571_s1 + $0x70] sm:$0xff]  ;;  %v50_v32 = vld [vmem:[%s571_s1 + $0x78] sm:$0xff]  ;;  %v34_v34 = vld [vmem:[%s572_s0 + $0x8] sm:$0xff] }
   0x9   :  { %366 = vmatpush3.bf16.msra.mxu0 %v363_v5  ;;  %396 = vmatprep.subr.bf16.mxu1 %v395_v17  ;;  %v387_v33 = vpack.c.bf16 %v50_v32, %v49_v31  ;;  %v151_v35 = vld [vmem:[%s573_s3 + $0x30] sm:$0xff]  ;;  %v152_v36 = vld [vmem:[%s573_s3 + $0x38] sm:$0xff]  ;;  %v153_v38 = vld [vmem:[%s573_s3 + $0x40] sm:$0xff] }
   0xa   :  { %368 = vmatprep.subr.bf16.mxu0 %v367_v8  ;;  %v403_v37 = vpack.c.bf16 %v152_v36, %v151_v35  ;;  %v154_v39 = vld [vmem:[%s573_s3 + $0x48] sm:$0xff]  ;;  %v155_v41 = vld [vmem:[%s573_s3 + $0x50] sm:$0xff]  ;;  %v156_v42 = vld [vmem:[%s573_s3 + $0x58] sm:$0xff] }
   0xb   :  { %v407_v40 = vpack.c.bf16 %v154_v39, %v153_v38  ;;  %v411_v43 = vpack.c.bf16 %v156_v42, %v155_v41  ;;  %v157_v44 = vld [vmem:[%s573_s3 + $0x60] sm:$0xff]  ;;  %v158_v45 = vld [vmem:[%s573_s3 + $0x68] sm:$0xff]  ;;  %v159_v47 = vld [vmem:[%s573_s3 + $0x70] sm:$0xff] }
   0xc   :  { %398 = vmatpush3.bf16.msra.mxu1 %v395_v17  ;;  %v415_v46 = vpack.c.bf16 %v158_v45, %v157_v44  ;;  %v160_v48 = vld [vmem:[%s573_s3 + $0x78] sm:$0xff]  ;;  %v252_v50 = vld [vmem:[%s574_s2] ss:$0 sm:$0xff] }
   0xd   :  { %370 = vmatpush3.bf16.msra.mxu0 %v367_v8  ;;  %400 = vmatprep.subr.bf16.mxu1 %v399_v23  ;;  %v419_v49 = vpack.c.bf16 %v160_v48, %v159_v47  ;;  %v251_v1 = vld [vmem:[%s575_s4] ss:$0 sm:$0xff] }
   0xe   :  { %372 = vmatprep.subr.bf16.mxu0 %v371_v20 }
  0x10   :  { %402 = vmatpush3.bf16.msra.mxu1 %v399_v23 }
  0x11   :  { %374 = vmatpush3.bf16.msra.mxu0 %v371_v20  ;;  %404 = vmatprep.subr.bf16.mxu1 %v403_v37 }
  0x12   :  { %376 = vmatprep.subr.bf16.mxu0 %v375_v24 }
  0x14   :  { %406 = vmatpush3.bf16.msra.mxu1 %v403_v37 }
  0x15   :  { %378 = vmatpush3.bf16.msra.mxu0 %v375_v24  ;;  %408 = vmatprep.subr.bf16.mxu1 %v407_v40 }
  0x16   :  { %380 = vmatprep.subr.bf16.mxu0 %v379_v27 }
  0x18   :  { %410 = vmatpush3.bf16.msra.mxu1 %v407_v40 }
  0x19   :  { %382 = vmatpush3.bf16.msra.mxu0 %v379_v27  ;;  %412 = vmatprep.subr.bf16.mxu1 %v411_v43 }
  0x1a   :  { %384 = vmatprep.subr.bf16.mxu0 %v383_v30 }
  0x1c   :  { %414 = vmatpush3.bf16.msra.mxu1 %v411_v43 }
  0x1d   :  { %386 = vmatpush3.bf16.msra.mxu0 %v383_v30  ;;  %416 = vmatprep.subr.bf16.mxu1 %v415_v46 }
  0x1e   :  { %388 = vmatprep.subr.bf16.mxu0 %v387_v33 }
  0x20   :  { %418 = vmatpush3.bf16.msra.mxu1 %v415_v46 }
  0x21   :  { %390 = vmatpush3.bf16.msra.mxu0 %v387_v33  ;;  %420 = vmatprep.subr.bf16.mxu1 %v419_v49 }
  0x24   :  { %322 = vmatmul.mubr.f32.vlgmr.msra.gmra.mrb[0].mxu0 %v34_v34  ;;  %422 = vmatpush3.bf16.msra.mxu1 %v419_v49 }
  0xf7   :  { %v323_v51 = vpop.f32.mrb[0].mxu0 }
  0xf8   :  { %v130_v52 = vadd.f32 %v323_v51, %v252_v50  ;;  %v124_v53 = vpop.f32.mrb[1].mxu0 }
  0xf9   :  { %v125_v54 = vadd.f32 %v252_v50, %v124_v53 }
  0xfa   :  { %v136_v55 = vmul.f32 0.70710677, %v130_v52  ;;  %v134_v62 = vmul.f32 0.5, %v130_v52 }
  0xfb   :  { %v135_v56 = vmul.f32 0.70710677, %v125_v54  ;;  %v133_v60 = vmul.f32 0.5, %v125_v54 }
  0xfc   :  { %423 = verf.f32 %v136_v55 }
  0xfd   :  { %425 = verf.f32 %v135_v56 }
 0x106   :  { %v424_v57 = vpop.eup %423 }
 0x107   :  { %v426_v58 = vpop.eup %425  ;;  %v140_v59 = vadd.f32 1.0, %v424_v57 }
 0x108   :  { %v139_v61 = vadd.f32 1.0, %v426_v58 }
 0x109   :  { %v142_v0 = vmul.f32 %v140_v59, %v134_v62 }
 0x10a   :  { %v141_v63 = vmul.f32 %v139_v61, %v133_v60 }
 0x10c   :  { %356 = vmatprep.mubr.f32.mxu1 %v141_v63 }
 0x10d   :  { %357 = vmatmul.mubr.f32.vlgmr.msra.gmra.mrb[0].mxu1 %v142_v0 }
 0x1e0   :  { %v358_v2 = vpop.f32.mrb[0].mxu1 }
 0x1e1   :  { %v237_v3 = vadd.f32 %v358_v2, %v251_v1  ;;  %v227_v4 = vpop.f32.mrb[1].mxu1 }
 0x1e2   :  { %v236_v5 = vadd.f32 %v251_v1, %v227_v4 }
 0x1e3   :  { %246 = vst [vmem:[%s576_s5 + $0x8] sm:$0xff] %v237_v3 }
 0x1e4   :  { %245 = vst [vmem:[%s576_s5] sm:$0xff] %v236_v5 }

</bundles_post_ra>
